<compile_context>
chip_gen: v7x
topology: tpu7x:2x2x1
jax: 0.10.0
libtpu: 0.0.40
codegen_flags: <defaults>
</compile_context>

<pallas_src>
import jax
import jax.numpy as jnp
from jax.experimental import pallas as pl
from jax.experimental.pallas import tpu as pltpu

# Module parameters (PyTorch defaults: Sigmoid(multiplier=5, limit=True))
MULTIPLIER = 5.0
LIMIT = True
CLAMP_LO, CLAMP_HI = -60.0, 60.0

_LANES = 128
_LANE_CANDIDATES = (1024, 512, 256, 128)
_BLOCK_BYTES = 4 * 1024 * 1024          # ~4 MiB per block (per operand)
_VMEM_LIMIT_BYTES = 32 * 1024 * 1024    # explicit scoped-VMEM budget (safe on all gens)


def _sigmoid_kernel(x_ref, o_ref):
    # Compute in f32 regardless of storage dtype (no extra HBM traffic; avoids
    # bf16 emulation on v5e and matches the f32 reference closely).
    x = x_ref[...].astype(jnp.float32)
    if MULTIPLIER is not None:
        x = x * MULTIPLIER
    if LIMIT:
        x = jnp.clip(x, CLAMP_LO, CLAMP_HI)
    # sigmoid(x) == 0.5 * tanh(0.5 * x) + 0.5 -> single EUP transcendental plus
    # VPU mul/add (exact, so the 1e-6 tolerance vs the exp form still holds).
    y = 0.5 * jnp.tanh(0.5 * x) + 0.5
    o_ref[...] = y.astype(o_ref.dtype)


def _choose_layout(n: int, itemsize: int):
    """Pick (lane width C, rows, tile_rows) for a lane-dense (rows, C) slab."""
    # Packed sublane count: 8 for f32, 16 for bf16/f16, 32 for int8/fp8.
    sublanes = max(8, 32 // itemsize)

    # 1) Prefer the widest lane dim that divides n exactly -> no pad, no slice.
    c = None
    for cand in _LANE_CANDIDATES:
        if n % cand == 0:
            c = cand
            break
    # 2) Otherwise the widest lane dim the input can reasonably fill; the tail
    #    is padded once (the only remaining case that pays an extra copy).
    if c is None:
        c = _LANES
        for cand in _LANE_CANDIDATES:
            if n >= sublanes * cand:
                c = cand
                break

    rows = pl.cdiv(n, c)

    # Rows per grid step from a dtype-aware byte budget, multiple of the packed
    # sublane count so interior blocks satisfy the (8, 128) tiling rule.
    tile_rows = (_BLOCK_BYTES // (c * itemsize)) // sublanes * sublanes
    tile_rows = max(sublanes, tile_rows)
    if tile_rows >= rows:
        # Single block along rows (full extent is always a legal block shape) ...
        tile_rows = rows
        # ... but prefer >=2 grid steps when there is enough data, so the
        # "parallel" axis can shard across both TensorCores on megacore chips
        # and the pipeline can overlap DMA with compute.
        if rows >= 2 * sublanes:
            tile_rows = pl.cdiv(pl.cdiv(rows, 2), sublanes) * sublanes

    return c, rows, tile_rows


def sigmoid_pallas(x: jax.Array) -> jax.Array:
    """Elementwise 1/(1+exp(-clamp(5*x, -60, 60))) via a Pallas TPU kernel."""
    orig_shape = x.shape
    orig_dtype = x.dtype

    n = x.size
    itemsize = jnp.dtype(orig_dtype).itemsize
    c, rows, tile_rows = _choose_layout(n, itemsize)
    padded_n = rows * c
    needs_pad = padded_n != n

    flat = x.reshape(-1)
    if needs_pad:
        flat = jnp.pad(flat, (0, padded_n - n))
    slab = flat.reshape(rows, c)

    grid = (pl.cdiv(rows, tile_rows),)   # ragged final block is masked by Pallas

    compiler_params = pltpu.CompilerParams(
        dimension_semantics=("parallel",),
        vmem_limit_bytes=_VMEM_LIMIT_BYTES,
        # If we had to pad, let XLA fuse the pad producer into the pallas_call
        # operand instead of materializing a padded copy in HBM.
        allow_input_fusion=[0] if needs_pad else None,
    )

    out = pl.pallas_call(
        _sigmoid_kernel,
        out_shape=jax.ShapeDtypeStruct((rows, c), orig_dtype),
        grid_spec=pltpu.PrefetchScalarGridSpec(
            num_scalar_prefetch=0,
            grid=grid,
            in_specs=[pl.BlockSpec((tile_rows, c), lambda i: (i, 0))],
            out_specs=pl.BlockSpec((tile_rows, c), lambda i: (i, 0)),
        ),
        compiler_params=compiler_params,
    )(slab)

    out_flat = out.reshape(-1)
    if needs_pad:
        out_flat = out_flat[:n]
    return out_flat.reshape(orig_shape)


if __name__ == "__main__":
    key = jax.random.PRNGKey(0)
    # NCHW input, same convention as the PyTorch module would receive.
    x = jax.random.normal(key, (2, 4, 16, 16), dtype=jnp.float32) * 30.0

    y = sigmoid_pallas(x)
    jax.block_until_ready(y)

    # Reference: 1 / (1 + exp(-clamp(5*x, -60, 60)))
    ref = 1.0 / (1.0 + jnp.exp(-jnp.clip(MULTIPLIER * x, CLAMP_LO, CLAMP_HI)))
    assert y.shape == x.shape and y.dtype == x.dtype
    assert jnp.allclose(y, ref, atol=1e-6, rtol=1e-6)

    print("KERNEL_OK")
</pallas_src>

<mosaic_0001>
module attributes {stable_mosaic.version = 11 : i64} {
  func.func @_sigmoid_kernel(%arg0: i32, %arg1: memref<2x1024xf32, #tpu.memory_space<vmem>>, %arg2: memref<2x1024xf32, #tpu.memory_space<vmem>>) attributes {dimension_semantics = [#tpu.dimension_semantics<parallel>], iteration_bounds = array<i64: 1>, scalar_prefetch = 0 : i64, scratch_operands = 0 : i64, tpu.core_type = #tpu.core_type<tc>, window_params = [{transform_indices = @transform_0, window_bounds = array<i64: 2, 1024>}, {transform_indices = @transform_1, window_bounds = array<i64: 2, 1024>}]} {
    %c0 = arith.constant 0 : index
    %c0_0 = arith.constant 0 : index
    %0 = vector.load %arg1[%c0, %c0_0] : memref<2x1024xf32, #tpu.memory_space<vmem>>, vector<2x1024xf32>
    %cst = arith.constant 5.000000e+00 : f32
    %1 = vector.broadcast %cst : f32 to vector<2x1024xf32>
    %2 = arith.mulf %0, %1 : vector<2x1024xf32>
    %cst_1 = arith.constant -6.000000e+01 : f32
    %cst_2 = arith.constant 6.000000e+01 : f32
    %3 = vector.broadcast %cst_1 : f32 to vector<2x1024xf32>
    %4 = arith.maximumf %3, %2 : vector<2x1024xf32>
    %5 = vector.broadcast %cst_2 : f32 to vector<2x1024xf32>
    %6 = arith.minimumf %5, %4 : vector<2x1024xf32>
    %cst_3 = arith.constant 5.000000e-01 : f32
    %7 = vector.broadcast %cst_3 : f32 to vector<2x1024xf32>
    %8 = arith.mulf %7, %6 : vector<2x1024xf32>
    %9 = math.tanh %8 : vector<2x1024xf32>
    %cst_4 = arith.constant 5.000000e-01 : f32
    %10 = vector.broadcast %cst_4 : f32 to vector<2x1024xf32>
    %11 = arith.mulf %10, %9 : vector<2x1024xf32>
    %cst_5 = arith.constant 5.000000e-01 : f32
    %12 = vector.broadcast %cst_5 : f32 to vector<2x1024xf32>
    %13 = arith.addf %11, %12 : vector<2x1024xf32>
    %c0_6 = arith.constant 0 : index
    %c0_7 = arith.constant 0 : index
    %14 = vector.load %arg2[%c0_6, %c0_7] : memref<2x1024xf32, #tpu.memory_space<vmem>>, vector<2x1024xf32>
    tpu.vector_store %arg2[%c0_6, %c0_7], %13 {strides = array<i32>} : memref<2x1024xf32, #tpu.memory_space<vmem>>, vector<2x1024xf32>,
    return
  }
  func.func @transform_0(%arg0: i32) -> (i32, i32) {
    %c0_i32 = arith.constant 0 : i32
    %c0_i32_0 = arith.constant 0 : i32
    return %arg0, %c0_i32 : i32, i32
  }
  func.func @transform_1(%arg0: i32) -> (i32, i32) {
    %c0_i32 = arith.constant 0 : i32
    %c0_i32_0 = arith.constant 0 : i32
    return %arg0, %c0_i32 : i32, i32
  }
}

</mosaic_0001>

<bundles_post_ra>
// kernel: tpu_custom_call.1
= control target key start
LH: loop header
LB: loop body
LE: loop exit
PB: predicated region body
PF: predicated region fallthrough
CT: control target
= control target key end

     0   :  { %6 = vsyncpa [#allocation3], 0  ;;  %s146_s0 = inlined_call_operand.hbm [shape: f32[2,1024], index: 0, kind: input, shape index: {}]   ;;  %s147_s1 = inlined_call_operand.hbm [shape: f32[2,1024], index: 1, kind: output, shape index: {}]  }
   0x1   :  { %7 = vsyncpa [#allocation4], 0  ;;  %s110_s6 = smov [#allocation2]   ;;  %s62_s10 = scalar_lea.hbm %s146_s0, 256 }
   0x2   :  { %s14_s7 = sshll.u32 %s110_s6, 4  ;;  %p63_p0 = scmp.ne.s32.totalorder %s146_s0, %s62_s10  ;;  %s15_s7 = int_to_ptr.vmem [resolvable:$true] %s14_s7 }
   0x3   :  { %p66_p1 = scmp.lt.u32.totalorder %s62_s10, %s146_s0 }
   0x5   :  { %p68_p2 = pnand %p66_p1, %p63_p0 }
   0x7   :  { %71 = shalt.err (!%p68_p2)
}
   0x8   :  { %s72_s15 = scalar_lea.vmem %s15_s7, 256  ;;  %p77_p4 = scmp.lt.s32.totalorder %s15_s7, %s15_s7 }
   0x9   :  { %p73_p3 = scmp.ne.s32.totalorder %s15_s7, %s72_s15  ;;  %p78_p5 = scmp.lt.s32.totalorder %s72_s15, %s72_s15 }
   0xb   :  { %p79_p6 = por %p78_p5, %p77_p4 }
   0xd   :  { %p80_p7 = pnand %p79_p6, %p73_p3 }
   0xf   :  { %83 = shalt.err (!%p80_p7)
}
  0x10   :  { %17 = dma.hbm_to_vmem [thread:$0]  %s146_s0, 256, %s15_s7, [#allocation3]  }
  0x11   :  { %106 = dma.done.wait [#allocation3], 256  }
  0x12   :  { %107 = vsyncadd [#allocation3], 4294967040  ;;  %v21_v0 = vld [vmem:[#allocation2] sm:$0xff]  ;;  %v22_v1 = vld [vmem:[#allocation2 + $0x8] sm:$0xff]  ;;  %s111_s18 = smov [#allocation5]  }
  0x13   :  { %v23_v2 = vmul.f32 5.0, %v21_v0  ;;  %v24_v3 = vmul.f32 5.0, %v22_v1  ;;  %s45_s19 = sshll.u32 %s111_s18, 4  ;;  %s46_s19 = int_to_ptr.vmem [resolvable:$true] %s45_s19 }
  0x14   :  { %s84_s0 = scalar_lea.vmem %s46_s19, 256  ;;  %p89_p9 = scmp.lt.s32.totalorder %s46_s19, %s46_s19 }
  0x15   :  { %v54_v4 = vclamps-f32 %v23_v2, 60.0  ;;  %v55_v5 = vclamps-f32 %v24_v3, 60.0  ;;  %p85_p8 = scmp.ne.s32.totalorder %s46_s19, %s84_s0  ;;  %p90_p10 = scmp.lt.s32.totalorder %s84_s0, %s84_s0 }
  0x17   :  { %v29_v6 = vmul.f32 0.5, %v54_v4  ;;  %v30_v7 = vmul.f32 0.5, %v55_v5  ;;  %p91_p11 = por %p90_p10, %p89_p9 }
  0x19   :  { %58 = vtanh.f32 %v29_v6  ;;  %p92_p12 = pnand %p91_p11, %p85_p8 }
  0x1a   :  { %60 = vtanh.f32 %v30_v7 }
  0x23   :  { %v59_v8 = vpop.eup %58 }
  0x24   :  { %v61_v9 = vpop.eup %60  ;;  %v33_v10 = vmul.f32 0.5, %v59_v8 }
  0x25   :  { %v34_v11 = vmul.f32 0.5, %v61_v9 }
  0x26   :  { %v35_v12 = vadd.f32 0.5, %v33_v10 }
  0x27   :  { %v36_v13 = vadd.f32 0.5, %v34_v11 }
  0x28   :  { %37 = vst [vmem:[#allocation5] sm:$0xff] %v35_v12 }
  0x29   :  { %38 = vst [vmem:[#allocation5 + $0x8] sm:$0xff] %v36_v13 }
  0x2a   :  { %95 = shalt.err (!%p92_p12)
}
  0x2b   :  { %s96_s22 = scalar_lea.hbm %s147_s1, 256 }
  0x2c   :  { %p97_p13 = scmp.ne.s32.totalorder %s147_s1, %s96_s22  ;;  %p100_p0 = scmp.lt.u32.totalorder %s96_s22, %s147_s1 }
  0x2e   :  { %p102_p1 = pnand %p100_p0, %p97_p13 }
  0x30   :  { %105 = shalt.err (!%p102_p1)
}
  0x31   :  { %48 = dma.vmem_to_hbm [thread:$0]  %s46_s19, 256, %s147_s1, [#allocation4]  }
  0x32   :  { %108 = dma.done.wait [#allocation4], 256  }
  0x33   :  { %109 = vsyncadd [#allocation4], 4294967040 }
  0x34   :  { %52 = vsyncpa [#allocation3], 1 }
  0x35   :  { %53 = vsyncpa [#allocation4], 1 }

</bundles_post_ra>
